<compile_context>
chip_gen: v6e
topology: v6e:2x2x1
jax: 0.10.0
libtpu: 0.0.40
codegen_flags: <defaults>
</compile_context>

<pallas_src>
import jax
import jax.numpy as jnp
import numpy as np
from jax.experimental import pallas as pl
from jax.experimental.pallas import tpu as pltpu


def _graphsage_scores_kernel(weight_ref, embeds_ref, out_ref):
    # weight_ref: (num_classes, embed_dim)  -- resident in VMEM across the grid
    # embeds_ref: (embed_dim, TILE_N)       -- streamed embedding strip
    # out_ref:    (num_classes, TILE_N)     -- lane-dense f32 score strip
    out_ref[...] = jnp.dot(
        weight_ref[...],
        embeds_ref[...],
        preferred_element_type=jnp.float32,
    )


def _default_tile_n():
    """Per-generation node-strip size (amortize ~0.35us/grid-step overhead)."""
    kind = ""
    try:
        kind = jax.devices()[0].device_kind.lower()
    except Exception:  # defensive: no devices / unusual backend string
        pass
    if "v5" in kind:   # v5e: ~0.82 TB/s HBM, 16 MiB default scoped VMEM
        return 16384
    if "v6" in kind:   # v6e: ~1.4 TB/s HBM, 32 MiB default scoped VMEM
        return 32768
    if "7" in kind:    # v7x: ~3.2 TB/s HBM; keep strips 2-TensorCore friendly
        return 32768
    return 16384       # unknown generation: conservative


def supervised_graphsage_forward(
    embeds,
    weight,
    *,
    tile_n=None,
    min_nodes_for_pallas=None,
    transpose_output=True,
):
    """Forward pass of SupervisedGraphSage.

    embeds: (embed_dim, num_nodes)   -- output of enc(nodes); streamed as-is in
                                        its own dtype (no cast, no padding).
    weight: (num_classes, embed_dim) -- classifier parameter.
    transpose_output: True (default) returns (num_nodes, num_classes) to match
        PyTorch's scores.t(); False returns the kernel-native (num_classes,
        num_nodes) layout and skips the extra XLA transpose pass (preferred
        when the downstream loss can consume that layout directly).
    """
    embed_dim, num_nodes = embeds.shape
    num_classes, embed_dim_w = weight.shape
    assert embed_dim == embed_dim_w

    # Only the tiny weight is cast to the streaming dtype; the big embedding
    # matrix is never rewritten in HBM.
    w = weight.astype(embeds.dtype)

    base_tile = int(tile_n) if tile_n is not None else _default_tile_n()
    if min_nodes_for_pallas is None:
        # Pallas only wins once several pipeline steps amortize launch cost.
        min_nodes_for_pallas = 2 * base_tile

    if num_nodes < min_nodes_for_pallas:
        scores = jnp.dot(w, embeds, preferred_element_type=jnp.float32)
        return scores.T if transpose_output else scores

    if base_tile >= num_nodes:
        eff_tile = num_nodes                             # single full block
    else:
        eff_tile = max(128, (base_tile // 128) * 128)    # lane-dense strips
    num_tiles = pl.cdiv(num_nodes, eff_tile)

    # Double-buffered VMEM footprint; only raise the scoped-VMEM limit when the
    # strips are large enough to approach the per-generation defaults.
    elem = jnp.dtype(embeds.dtype).itemsize
    buf_bytes = 2 * (embed_dim * eff_tile * elem          # streamed embeds
                     + num_classes * eff_tile * 4         # f32 score strip
                     + num_classes * embed_dim * elem)    # resident weight
    vmem_limit = None
    if buf_bytes > 12 * 1024 * 1024:
        vmem_limit = min(max(int(1.5 * buf_bytes), 32 * 1024 * 1024),
                         64 * 1024 * 1024)

    cost = pl.CostEstimate(
        flops=2 * num_classes * embed_dim * num_nodes,
        transcendentals=0,
        bytes_accessed=(embeds.size * elem
                        + w.size * elem
                        + num_classes * num_nodes * 4),
    )

    scores = pl.pallas_call(
        _graphsage_scores_kernel,
        out_shape=jax.ShapeDtypeStruct((num_classes, num_nodes), jnp.float32),
        grid_spec=pl.GridSpec(
            grid=(num_tiles,),
            in_specs=[
                # Weight: tiny, constant block index -> stays resident in VMEM.
                pl.BlockSpec((num_classes, embed_dim), lambda i: (0, 0)),
                # Embeds: streamed strip-by-strip along the node (lane) axis;
                # the ragged last strip is handled by Pallas edge masking.
                pl.BlockSpec((embed_dim, eff_tile), lambda i: (0, i)),
            ],
            out_specs=pl.BlockSpec((num_classes, eff_tile), lambda i: (0, i)),
        ),
        compiler_params=pltpu.CompilerParams(
            dimension_semantics=("parallel",),
            vmem_limit_bytes=vmem_limit,
        ),
        cost_estimate=cost,
    )(w, embeds)

    # scores: (num_classes, num_nodes). The skinny transpose matches PyTorch's
    # scores.t(); pass transpose_output=False to consume (C, N) at zero cost.
    return scores.T if transpose_output else scores


if __name__ == "__main__":
    num_classes = 7
    embed_dim = 32

    key = jax.random.PRNGKey(0)
    k_enc_small, k_enc_big, k_w = jax.random.split(key, 3)

    # nn.Parameter(num_classes, embed_dim) with xavier_uniform_ init.
    bound = (6.0 / (num_classes + embed_dim)) ** 0.5
    weight = jax.random.uniform(
        k_w, (num_classes, embed_dim), dtype=jnp.float32,
        minval=-bound, maxval=bound,
    )

    # --- Case 1: tiny node batch -> plain-XLA fallback path. ---
    n_small = 8
    embeds_small = jax.random.normal(
        k_enc_small, (embed_dim, n_small), dtype=jnp.float32)
    out_small = jax.block_until_ready(
        supervised_graphsage_forward(embeds_small, weight))
    ref_small = jnp.dot(
        weight, embeds_small, preferred_element_type=jnp.float32).T
    assert out_small.shape == (n_small, num_classes)
    assert jnp.allclose(out_small, ref_small, atol=1e-4, rtol=1e-4)

    # --- Case 2: Pallas path, f32 streaming, multiple strips + ragged last
    #     block (1000 = 3*256 + 232), small tile to exercise the pipeline. ---
    n_big = 1000
    embeds_big = jax.random.normal(
        k_enc_big, (embed_dim, n_big), dtype=jnp.float32)
    out_f32 = jax.block_until_ready(
        supervised_graphsage_forward(
            embeds_big, weight, tile_n=256, min_nodes_for_pallas=512))
    ref_f32 = jnp.dot(
        weight, embeds_big, preferred_element_type=jnp.float32).T
    assert out_f32.shape == (n_big, num_classes)
    assert jnp.allclose(out_f32, ref_f32, atol=1e-4, rtol=1e-4)

    # Zero-cost layout for downstream loss: (num_classes, num_nodes).
    out_cn = jax.block_until_ready(
        supervised_graphsage_forward(
            embeds_big, weight, tile_n=256, min_nodes_for_pallas=512,
            transpose_output=False))
    assert out_cn.shape == (num_classes, n_big)
    assert jnp.allclose(out_cn.T, ref_f32, atol=1e-4, rtol=1e-4)

    # --- Case 3: Pallas path, single full-dim block (tile >= num_nodes). ---
    out_full = jax.block_until_ready(
        supervised_graphsage_forward(
            embeds_big, weight, tile_n=4096, min_nodes_for_pallas=0))
    assert out_full.shape == (n_big, num_classes)
    assert jnp.allclose(out_full, ref_f32, atol=1e-4, rtol=1e-4)

    # --- Case 4: producer (enc) emits bf16 -> bf16 streaming, f32 accumulate. ---
    embeds_bf16 = embeds_big.astype(jnp.bfloat16)
    out_bf16 = jax.block_until_ready(
        supervised_graphsage_forward(
            embeds_bf16, weight, tile_n=128, min_nodes_for_pallas=256))
    ref_bf16 = jnp.dot(
        weight.astype(jnp.bfloat16), embeds_bf16,
        preferred_element_type=jnp.float32).T
    assert out_bf16.shape == (n_big, num_classes)
    assert out_bf16.dtype == jnp.float32
    assert jnp.allclose(out_bf16, ref_bf16, atol=1e-2, rtol=1e-2)
    # Loose sanity check against an fp64 host reference.
    ref_np = (np.asarray(weight, np.float64)
              @ np.asarray(embeds_big, np.float64)).T
    assert np.allclose(np.asarray(out_bf16, np.float64), ref_np,
                       atol=1e-1, rtol=1e-1)

    print("KERNEL_OK")
</pallas_src>

<mosaic_0001>
module attributes {stable_mosaic.version = 11 : i64} {
  func.func @_graphsage_scores_kernel(%arg0: i32, %arg1: memref<7x32xf32, #tpu.memory_space<vmem>>, %arg2: memref<32x256xf32, #tpu.memory_space<vmem>>, %arg3: memref<7x256xf32, #tpu.memory_space<vmem>>) attributes {dimension_semantics = [#tpu.dimension_semantics<parallel>], iteration_bounds = array<i64: 4>, scalar_prefetch = 0 : i64, scratch_operands = 0 : i64, tpu.core_type = #tpu.core_type<tc>, window_params = [{pipeline_mode = #tpu.pipeline_mode<synchronous>, transform_indices = @transform_0, window_bounds = array<i64: 7, 32>}, {transform_indices = @transform_1, window_bounds = array<i64: 32, 256>}, {transform_indices = @transform_2, window_bounds = array<i64: 7, 256>}]} {
    %c0 = arith.constant 0 : index
    %c0_0 = arith.constant 0 : index
    %0 = vector.load %arg1[%c0, %c0_0] : memref<7x32xf32, #tpu.memory_space<vmem>>, vector<7x32xf32>
    %c0_1 = arith.constant 0 : index
    %c0_2 = arith.constant 0 : index
    %1 = vector.load %arg2[%c0_1, %c0_2] : memref<32x256xf32, #tpu.memory_space<vmem>>, vector<32x256xf32>
    %cst = arith.constant dense<0.000000e+00> : vector<7x256xf32>
    %2 = tpu.matmul %0, %1, %cst {dimension_numbers = #tpu.dot_dimension_numbers<[1], [0], [0], [1], [0, 0, 1, 1], [], []>} : vector<7x32xf32>, vector<32x256xf32>, vector<7x256xf32> -> vector<7x256xf32>
    %c0_3 = arith.constant 0 : index
    %c0_4 = arith.constant 0 : index
    %3 = vector.load %arg3[%c0_3, %c0_4] : memref<7x256xf32, #tpu.memory_space<vmem>>, vector<7x256xf32>
    tpu.vector_store %arg3[%c0_3, %c0_4], %2 {strides = array<i32>} : memref<7x256xf32, #tpu.memory_space<vmem>>, vector<7x256xf32>,
    return
  }
  func.func @transform_0(%arg0: i32) -> (i32, i32) {
    %c0_i32 = arith.constant 0 : i32
    %c0_i32_0 = arith.constant 0 : i32
    %c0_i32_1 = arith.constant 0 : i32
    return %c0_i32, %c0_i32_0 : i32, i32
  }
  func.func @transform_1(%arg0: i32) -> (i32, i32) {
    %c0_i32 = arith.constant 0 : i32
    %c0_i32_0 = arith.constant 0 : i32
    return %c0_i32, %arg0 : i32, i32
  }
  func.func @transform_2(%arg0: i32) -> (i32, i32) {
    %c0_i32 = arith.constant 0 : i32
    %c0_i32_0 = arith.constant 0 : i32
    return %c0_i32, %arg0 : i32, i32
  }
}

</mosaic_0001>

<bundles_post_ra>
// kernel: tpu_custom_call.1
= control target key start
LH: loop header
LB: loop body
LE: loop exit
PB: predicated region body
PF: predicated region fallthrough
CT: control target
= control target key end

     0   :  { %7 = vsyncpa [#allocation3], 0  ;;  %s758_s0 = inlined_call_operand.hbm [shape: f32[7,32], index: 0, kind: input, shape index: {}]   ;;  %s759_s1 = inlined_call_operand.hbm [shape: f32[32,1000], index: 1, kind: input, shape index: {}]   ;;  %s760_s2 = inlined_call_operand.hbm [shape: f32[7,1000], index: 2, kind: output, shape index: {}]  }
   0x1   :  { %8 = vsyncpa [#allocation6], 0 }
   0x2   :  { %10 = vsyncpa [#allocation6 + $0x1], 0 }
   0x3   :  { %11 = vsyncpa [#allocation4], 0 }
   0x4   :  { %13 = vsyncpa [#allocation4 + $0x1], 0  ;;  %s586_s9 = smov 0   ;;  %s588_s10 = smov 0  }
   0x5   :  { %s590_s11 = smov 0   ;;  %s592_s12 = smov 0  }
   0x6 LB: > { %s607_s13 = sadd.s32 4294967295, %s562_s12   ;;  %s360_s14 = sadd.s32 4294967294, %s562_s12   ;;  %s562_s12 = sphi %s592_s12, %s781_s12   ;;  %s558_s11 = sphi %s590_s11, %s780_s11   ;;  %s554_s10 = sphi %s588_s10, %s779_s10   ;;  %s550_s9 = sphi %s586_s9, %s778_s9  }
   0x7   : > { %s611_s15 = sadd.s32 1, %s562_s12   ;;  %s47_s16 = sadd.s32 1, %s558_s11 }
   0x8   : > { %s44_s17 = ssub.s32 %s562_s12, %s611_s15  ;;  %p54_p0 = scmp.ne.s32.totalorder %s558_s11, %s554_s10 }
   0x9   : > { %p45_p1 = scmp.eq.s32.totalorder %s44_s17, 0  ;;  %p55_p2 = scmp.eq.s32.totalorder %s562_s12, 0 }
   0xa   : > { %p60_p3 = scmp.ne.s32.totalorder %s554_s10, %s550_s9  ;;  %p762_p4 = scmp.eq.s32.totalorder %s607_s13, 0 }
   0xb   : > { %s623_s18 = scalar_select %p45_p1, %s558_s11, %s47_s16  }
   0xc   : > { %p625_p5 = por %p55_p2, %p54_p0  ;;  %p631_p6 = por %p762_p4, %p60_p3 }
   0xd   : > { %p84_p7 = scmp.eq.s32.totalorder %s607_s13, 3  ;;  %p90_p8 = scmp.eq.s32.totalorder %s360_s14, 3 }
   0xe   : > { %s766_s20 = scalar_select %p631_p6, 1, 0 }
   0xf   : > { %p361_p9 = scmp.ge.s32.totalorder %s562_s12, 1  ;;  %p97_p10 = scmp.lt.s32.totalorder %s562_s12, 5 }
  0x10   : > { %p638_p11 = por %p84_p7, %p54_p0  ;;  %p642_p12 = por %p90_p8, %p60_p3 }
  0x11   : > { %p646_p13 = pnand %p361_p9, %p97_p10  ;;  %s564_s24 = smov [#allocation2]  }
  0x12   : > { %s767_s21 = scalar_select %p638_p11, 1, 0 }
  0x13   : > { %s768_s22 = scalar_select %p642_p12, 1, 0 }
  0x14   : > { %s769_s23 = scalar_select %p646_p13, 1, 0 }
  0x15   : > { %p387_p1 = pneg %p646_p13  ;;  %s110_s25 = sshll.u32 %s564_s24, 4  ;;  %s111_s25 = int_to_ptr.vmem [resolvable:$true] %s110_s25 }
  0x16   : > { %p400_p2 = scmp.lt.s32.totalorder %s562_s12, 4  ;;  %s121_s27 = sand.u32 1, %s558_s11  }
  0x17   : > { %p655_p0 = pnand %p387_p1, %p762_p4  ;;  %s364_s29 = sshll.u32 %s121_s27, 6 }
  0x18   : > { %p662_p3 = pnand %p400_p2, %p625_p5  ;;  %s451_s30 = scalar_lea.vmem %s111_s25, 128 }
  0x19   : > { %p442_p7 = pneg %p655_p0  ;;  %p452_p8 = scmp.ne.s32.totalorder %s111_s25, %s451_s30 }
  0x1a   : > { %p459_p12 = scmp.lt.s32.totalorder %s111_s25, %s111_s25  ;;  %p460_p11 = scmp.lt.s32.totalorder %s451_s30, %s451_s30 }
  0x1b   : > { %p454_p9 = pnand %p452_p8, %p442_p7 }
  0x1c   : > { %p461_p1 = por %p460_p11, %p459_p12 }
  0x1d   : > { %p455_p10 = pneg %p454_p9 }
  0x1f   : > { %p462_p4 = pnand %p461_p1, %p455_p10 }
  0x21   : > { %465 = shalt.err (!%p462_p4)
}
  0x22   : > { %390 = dma.hbm_to_vmem [thread:$0]  (!%p655_p0), %s758_s0, 128, %s111_s25, [#allocation3]  }
  0x23   : > { %s377_s5 = sshll.u32 %s562_s12, 8  ;;  %s125_s6 = scalar_lea.vmem [#allocation5], %s364_s29 }
  0x24   : > { %s132_s7 = sshll.u32 %s125_s6, 4  ;;  %s677_s16 = scalar_lea.hbm %s759_s1, %s377_s5  ;;  %s679_s7 = int_to_ptr.vmem [resolvable:$true] %s132_s7 }
  0x25   : > { %s681_s17 = scalar_lea.sflag [#allocation6], %s121_s27  ;;  %s466_s19 = scalar_lea.hbm %s677_s16, 1024 }
  0x26   : > { %p467_p4 = scmp.ne.s32.totalorder %s677_s16, %s466_s19  ;;  %p468_p5 = pneg %p662_p3 }
  0x27   : > { %s471_s26 = scalar_lea.hbm %s759_s1, 4096  ;;  %p472_p2 = scmp.lt.s32.totalorder %s677_s16, %s759_s1 }
  0x28   : > { %p469_p11 = pnand %p468_p5, %p467_p4  ;;  %p473_p0 = scmp.lt.s32.totalorder %s471_s26, %s466_s19 }
  0x2a   : > { %p470_p12 = pneg %p469_p11  ;;  %p474_p7 = por %p473_p0, %p472_p2 }
  0x2c   : > { %p475_p8 = pnand %p474_p7, %p470_p12 }
  0x2e   : > { %478 = shalt.err (!%p475_p8)
}
  0x2f   : > { %s479_s27 = scalar_lea.vmem %s679_s7, 1024  ;;  %s565_s3 = smov [#allocation5]  }
  0x30   : > { %p480_p9 = scmp.ne.s32.totalorder %s679_s7, %s479_s27  ;;  %s484_s4 = sshll.u32 %s565_s3, 4  ;;  %s485_s4 = int_to_ptr.vmem [resolvable:$false] %s484_s4 }
  0x31   : > { %s486_s5 = scalar_lea.vmem %s485_s4, 2048  ;;  %p487_p4 = scmp.lt.s32.totalorder %s679_s7, %s485_s4 }
  0x32   : > { %p482_p10 = pnand %p480_p9, %p468_p5  ;;  %p488_p11 = scmp.lt.s32.totalorder %s486_s5, %s479_s27 }
  0x34   : > { %p483_p1 = pneg %p482_p10  ;;  %p489_p6 = por %p488_p11, %p487_p4 }
  0x36   : > { %p490_p13 = pnand %p489_p6, %p483_p1 }
  0x38   : > { %493 = shalt.err (!%p490_p13)
}
  0x39   : > { %s566_s6 = smov 1024   ;;  %s567_s8 = smov 256  }
  0x3a   : > { %s568_s14 = smov 16   ;;  %p772_p5 = scmp.ne.s32.totalorder %s769_s23, 0 }
  0x3b   : > { %394 = dma.hbm_to_vmem [thread:$0]  (!%p662_p3), %s677_s16, 1024, %s679_s7, %s681_s17, %s566_s6, %s567_s8, %s568_s14  }
  0x3c   : > { %144 = sbr.rel (%p772_p5) target bundleno = 287 (0x11f), region = 28  ;;  %p773_p12 = scmp.eq.s32.totalorder (!%p772_p5), %s607_s13, 0 }
  0x41   : > { %537 = dma.done.wait (%p773_p12), [#allocation3], 128   ;;  %p774_p2 = pmov %p773_p12 }
  0x42   : > { %s709_s19 = sand.u32 1, %s554_s10   ;;  %p775_p6 = scmp.ne.s32.totalorder %s766_s20, 0 }
  0x43   : > { %539 = vsyncadd (%p774_p2), [#allocation3], 4294967168  ;;  %s369_s24 = sshll.u32 %s709_s19, 6  ;;  %s151_s25 = scalar_lea.sflag [#allocation6], %s709_s19 }
  0x44   : > { %s154_s26 = scalar_lea.vmem [#allocation5], %s369_s24 }
  0x45   : > { %541 = dma.done.wait (%p775_p6), %s151_s25, 1024  }
  0x46   : > { %543 = vsyncadd (%p775_p6), %s151_s25, 4294966272  ;;  %v569_v0 = vmov 0.0   ;;  %v185_v1 = vld [vmem:[%s154_s26 + $0x38] sm:$0xff]  ;;  %v184_v2 = vld [vmem:[%s154_s26 + $0x30] sm:$0xff]  ;;  %vm186_vm0 = vcmask 261120   ;;  %s370_s20 = sshll.u32 %s709_s19, 4 }
  0x47   : > { %254 = vmatprep.mubr.f32.mxu0 %v569_v0  ;;  %v183_v3 = vld [vmem:[%s154_s26 + $0x28] sm:$0xff]  ;;  %214 = vmatprep.subr.mxu0 %v185_v1  ;;  %v182_v4 = vld [vmem:[%s154_s26 + $0x20] sm:$0xff]  ;;  %v181_v5 = vld [vmem:[%s154_s26 + $0x18] sm:$0xff]  ;;  %s174_s23 = scalar_lea.vmem [#allocation7], %s370_s20  ;;  %s378_s7 = sshll.u32 %s607_s13, 8 }
  0x48   : > { %215 = vmatpush1.msra.mxu0 %v184_v2  ;;  %v180_v6 = vld [vmem:[%s154_s26 + $0x10] sm:$0xff]  ;;  %v179_v7 = vld [vmem:[%s154_s26 + $0x8] sm:$0xff]  ;;  %v178_v8 = vld [vmem:[%s154_s26] sm:$0xff]  ;;  %s278_s28 = sshll.u32 %s174_s23, 4  ;;  %s276_s29 = scalar_lea.hbm %s760_s2, %s378_s7  ;;  %s719_s28 = int_to_ptr.vmem [resolvable:$true] %s278_s28 }
  0x49   : > { %216 = vmatprep.subr.mxu0 %v183_v3  ;;  %v177_v9 = vld [vmem:[#allocation2] sm:$0x7f]  ;;  %s264_s30 = scalar_lea.sflag [#allocation4], %s709_s19  ;;  %s494_s27 = scalar_lea.vmem %s719_s28, 256 }
  0x4a   : > { %217 = vmatpush1.msra.mxu0 %v182_v4  ;;  %p495_p13 = scmp.ne.s32.totalorder %s719_s28, %s494_s27  ;;  %p776_p3 = scmp.ne.s32.totalorder %s767_s21, 0 }
  0x4b   : > { %218 = vmatprep.subr.mxu0 %v181_v5  ;;  %s570_s13 = smov [#allocation7]  }
  0x4c   : > { %219 = vmatpush1.msra.mxu0 %v180_v6  ;;  %p496_p0 = pnand %p495_p13, %p776_p3  ;;  %s498_s3 = sshll.u32 %s570_s13, 4  ;;  %s499_s3 = int_to_ptr.vmem [resolvable:$false] %s498_s3 }
  0x4d   : > { %220 = vmatprep.subr.mxu0 %v179_v7  ;;  %s500_s4 = scalar_lea.vmem %s499_s3, 512  ;;  %p501_p8 = scmp.lt.s32.totalorder %s719_s28, %s499_s3 }
  0x4e   : > { %221 = vmatpush1.msra.mxu0 %v178_v8  ;;  %p497_p7 = pneg %p496_p0  ;;  %p502_p9 = scmp.lt.s32.totalorder %s500_s4, %s494_s27 }
  0x4f   : > { %371 = vmatmul.mubr.msk.f32.vlgmr.msra.gmra.mxu0 %vm186_vm0, %v177_v9 }
  0x50   : > { %p503_p10 = por %p502_p9, %p501_p8 }
  0x52   : > { %p504_p1 = pnand %p503_p10, %p497_p7 }
 0x10f   : > { %v256_v10 = vpop.f32.mrf.mxu0 }
 0x110   : > { %261 = vst [vmem:[%s174_s23] sm:$0x7f] %v256_v10 }
 0x111   : > { %v258_v11 = vpop.f32.mrf.mxu0 }
 0x112   : > { %262 = vst [vmem:[%s174_s23 + $0x8] sm:$0x7f] %v258_v11 }
 0x113   : > { %507 = shalt.err (!%p504_p1)
}
 0x114   : > { %s508_s5 = scalar_lea.hbm %s276_s29, 256  ;;  %s512_s14 = scalar_lea.hbm %s760_s2, 1024 }
 0x115   : > { %p509_p4 = scmp.ne.s32.totalorder %s276_s29, %s508_s5  ;;  %p513_p12 = scmp.lt.s32.totalorder %s276_s29, %s760_s2 }
 0x116   : > { %p514_p2 = scmp.lt.s32.totalorder %s512_s14, %s508_s5 }
 0x117   : > { %p510_p11 = pnand %p509_p4, %p776_p3 }
 0x118   : > { %p515_p6 = por %p514_p2, %p513_p12 }
 0x119   : > { %p511_p5 = pneg %p510_p11 }
 0x11b   : > { %p516_p13 = pnand %p515_p6, %p511_p5 }
 0x11d   : > { %519 = shalt.err (!%p516_p13)
}
 0x11e   : > { %385 = dma.vmem_to_hbm [thread:$0]  (%p776_p3), %s719_s28, 256, %s276_s29, %s264_s30  }
 0x11f PF: > { %p402_p0 = scmp.ge.s32.totalorder %s562_s12, 2  ;;  %s290_s25 = sand.u32 1, %s550_s9  }
 0x120   : > { %p777_p7 = scmp.ne.s32.totalorder %s768_s22, 0  ;;  %s291_s26 = scalar_lea.sflag [#allocation4], %s290_s25 }
 0x122   : > { %p396_p8 = pnand %p402_p0, %p777_p7 }
 0x124   : > { %p397_p9 = pneg %p396_p8 }
 0x126   : > { %545 = dma.done.wait (%p397_p9), %s291_s26, 256  }
 0x127   : > { %547 = vsyncadd (%p397_p9), %s291_s26, 4294967040  ;;  %p16_p10 = scmp.ge.s32.totalorder %s611_s15, 6   ;;  %s778_s9 = smov %s554_s10 }
 0x128   : > { %s779_s10 = smov %s558_s11  ;;  %s780_s11 = smov %s623_s18 }
 0x129   : > { %s781_s12 = smov %s611_s15  ;;  %18 = sbr.rel (!%p16_p10) target bundleno = 6 (0x6), region = 78 }
 0x12e   :  { %296 = vsyncpa [#allocation3], 1 }
 0x12f   :  { %298 = vsyncpa [#allocation3 + $0x1], 1 }
 0x130   :  { %299 = vsyncpa [#allocation6], 1 }
 0x131   :  { %301 = vsyncpa [#allocation6 + $0x1], 1 }
 0x132   :  { %302 = vsyncpa [#allocation4], 1 }
 0x133   :  { %304 = vsyncpa [#allocation4 + $0x1], 1 }

</bundles_post_ra>
